<compile_context>
chip_gen: v7x
topology: tpu7x:2x2x1
jax: 0.10.0
libtpu: 0.0.40
codegen_flags: <defaults>
</compile_context>

<pallas_src>
import jax
import jax.numpy as jnp
from jax.experimental import pallas as pl
from jax.experimental.pallas import tpu as pltpu


def _round_up(x, m):
    return (x + m - 1) // m * m


def _convtext_kernel(x_ref, wconv_ref, mask_ref, wfc_ref, bfc_ref, out_ref):
    # x_ref    : (TILE_B, L_pad, D)   bf16  embedded tokens (zero-padded seq/batch)
    # wconv_ref: (k_max, D, F_pad)    bf16  fused, zero-tap-padded conv weight
    # mask_ref : (T_pad, F_pad)       f32   bias  (+ -1e30 at invalid time positions)
    # wfc_ref  : (F_pad, C_pad)       bf16  FC weight (zero-padded rows/cols)
    # bfc_ref  : (1, C_pad)           f32   FC bias (zero-padded)
    # out_ref  : (TILE_B, C_pad)      f32   logits (lane-dense)
    tile_b, l_pad, d = x_ref.shape
    t_pad, f_pad = mask_ref.shape
    k_max = wconv_ref.shape[0]

    # All convs fused into one weight; batch folded into the matmul M dim.
    # k_max is small & static -> short unrolled chain of MXU matmuls sharing
    # one f32 accumulator. Each tap is sliced straight from the Ref so only
    # the slice being fed to the MXU is live.
    acc = jnp.dot(x_ref[:, 0:t_pad, :].reshape(tile_b * t_pad, d),
                  wconv_ref[0], preferred_element_type=jnp.float32)
    for j in range(1, k_max):
        acc = acc + jnp.dot(x_ref[:, j:j + t_pad, :].reshape(tile_b * t_pad, d),
                            wconv_ref[j], preferred_element_type=jnp.float32)

    s = acc.reshape(tile_b, t_pad, f_pad)                     # (TILE_B, T_pad, F_pad)
    # bias + invalid-position mask folded into one add, then ReLU, then
    # max-pool over time (sublane reduce -> XLU slot, off the VALU path).
    s = jnp.maximum(s + mask_ref[...][None], 0.0)
    feat = jnp.max(s, axis=1)                                 # (TILE_B, F_pad) f32

    # dropout: identity (eval semantics). Final FC with lane-dense N.
    logits = jnp.dot(feat.astype(wfc_ref.dtype), wfc_ref[...],
                     preferred_element_type=jnp.float32)
    out_ref[...] = logits + bfc_ref[...]                      # (TILE_B, C_pad) f32


def conv_text_forward(x_emb, conv_params, fc_w, fc_b, *, max_tile_b=128,
                      vmem_tile_budget=24 * 1024 * 1024):
    """ConvText forward (eval mode) on pre-embedded input.

    x_emb      : (B, L, D) f32
    conv_params: list of (w, b) with w: (k, D, C), b: (1, C)
    fc_w       : (len(convs)*C, n_classes); fc_b: (1, n_classes)
    """
    B, L, D = x_emb.shape
    n_convs = len(conv_params)
    C = conv_params[0][0].shape[2]
    n_classes = fc_w.shape[1]
    ks = [w.shape[0] for (w, _) in conv_params]
    k_max, k_min = max(ks), min(ks)

    T_pos = L - k_min + 1                   # most valid time positions of any conv
    T_pad = _round_up(T_pos, 8)             # sublane-friendly position count
    L_pad = T_pad + k_max - 1               # padded seq length fed to the kernel
    F = n_convs * C
    F_pad = _round_up(F, 128)               # lane-dense fused conv channels
    C_pad = _round_up(n_classes, 128)       # lane-dense logits

    # --- batch tile: largest multiple of 8 fitting a conservative VMEM budget
    #     (sized so double-buffered tiles stay well within v7x's 64 MiB VMEM). ---
    bytes_per_row = (2 * L_pad * D * 2          # double-buffered bf16 x tile
                     + T_pad * D * 2            # one shifted tap slice (bf16)
                     + 2 * T_pad * F_pad * 4)   # f32 conv accumulator + masked copy
    tile_b = max(8, min(max_tile_b,
                        (vmem_tile_budget // max(bytes_per_row, 1)) // 8 * 8))
    tile_b = min(tile_b, _round_up(B, 8))       # tiny batch -> single grid step
    B_pad = _round_up(B, tile_b)

    # ----------------- one-time (trace-time) operand preprocessing -----------------
    x_pad = jnp.zeros((B_pad, L_pad, D), jnp.bfloat16)
    x_pad = x_pad.at[:B, :L, :].set(x_emb.astype(jnp.bfloat16))

    w_fused = jnp.zeros((k_max, D, F_pad), jnp.float32)
    bias_full = jnp.zeros((F_pad,), jnp.float32)
    valid = jnp.zeros((T_pad, F_pad), bool)
    t_idx = jnp.arange(T_pad)
    for i, (w, b) in enumerate(conv_params):
        k = w.shape[0]
        w_fused = w_fused.at[:k, :, i * C:(i + 1) * C].set(w)
        bias_full = bias_full.at[i * C:(i + 1) * C].set(b.reshape(-1))
        col_valid = (t_idx <= L - k)[:, None]                 # position t valid iff t <= L-k
        valid = valid.at[:, i * C:(i + 1) * C].set(
            jnp.broadcast_to(col_valid, (T_pad, C)))
    w_conv = w_fused.astype(jnp.bfloat16)                     # (k_max, D, F_pad)
    # bias + validity folded into a single additive term (invalid -> -1e30 -> ReLU -> 0)
    add_mask = jnp.where(valid, bias_full[None, :], -1e30).astype(jnp.float32)

    wfc = jnp.zeros((F_pad, C_pad), jnp.float32)
    wfc = wfc.at[:F, :n_classes].set(fc_w).astype(jnp.bfloat16)
    bfc = jnp.zeros((1, C_pad), jnp.float32).at[:, :n_classes].set(
        fc_b.reshape(1, -1))

    out = pl.pallas_call(
        _convtext_kernel,
        out_shape=jax.ShapeDtypeStruct((B_pad, C_pad), jnp.float32),
        grid=(B_pad // tile_b,),
        in_specs=[
            pl.BlockSpec((tile_b, L_pad, D), lambda b: (b, 0, 0)),
            pl.BlockSpec((k_max, D, F_pad), lambda b: (0, 0, 0)),
            pl.BlockSpec((T_pad, F_pad), lambda b: (0, 0)),
            pl.BlockSpec((F_pad, C_pad), lambda b: (0, 0)),
            pl.BlockSpec((1, C_pad), lambda b: (0, 0)),
        ],
        out_specs=pl.BlockSpec((tile_b, C_pad), lambda b: (b, 0)),
        compiler_params=pltpu.CompilerParams(
            dimension_semantics=("parallel",),      # megacore / v7x dual-TC sharding
            vmem_limit_bytes=48 * 1024 * 1024,
        ),
    )(x_pad, w_conv, add_mask, wfc, bfc)
    return out[:B, :n_classes]


def _reference_forward(x_emb, conv_params, fc_w, fc_b):
    """Pure-JAX f32 reference mirroring the PyTorch forward (eval mode)."""
    feats = []
    for (w, bias) in conv_params:
        k = w.shape[0]
        t_out = x_emb.shape[1] - k + 1
        s = bias[None]                            # (1, 1, C)
        for j in range(k):
            s = s + jnp.einsum("bld,dc->blc", x_emb[:, j:j + t_out, :], w[j])
        s = jnp.maximum(s, 0.0)
        feats.append(jnp.max(s, axis=1))          # (B, C)
    feat = jnp.concatenate(feats, axis=-1)
    return feat @ fc_w + fc_b


if __name__ == "__main__":
    # Model hyperparameters (args.n_kernel=8, args.kernel_sizes=(3,4,5), static=False)
    n_vocab, embed_dim, n_classes = 50, 32, 4
    n_kernel, kernel_sizes = 8, (3, 4, 5)
    B, L = 2, 16

    key = jax.random.PRNGKey(0)
    keys = jax.random.split(key, 4 + 2 * len(kernel_sizes))

    embed_table = jax.random.normal(keys[0], (n_vocab, embed_dim), jnp.float32) * 0.1
    conv_params = []
    for i, k in enumerate(kernel_sizes):
        w = jax.random.normal(keys[1 + 2 * i], (k, embed_dim, n_kernel), jnp.float32) * 0.1
        b = jax.random.normal(keys[2 + 2 * i], (1, n_kernel), jnp.float32) * 0.1
        conv_params.append((w, b))
    fc_w = jax.random.normal(keys[-3], (len(kernel_sizes) * n_kernel, n_classes),
                             jnp.float32) * 0.1
    fc_b = jax.random.normal(keys[-2], (1, n_classes), jnp.float32) * 0.1

    tokens = jax.random.randint(keys[-1], (B, L), 0, n_vocab)
    x_emb = jnp.take(embed_table, tokens, axis=0)     # embedding lookup (plain-JAX glue)

    logits = conv_text_forward(x_emb, conv_params, fc_w, fc_b)
    jax.block_until_ready(logits)
    assert logits.shape == (B, n_classes)

    ref = _reference_forward(x_emb, conv_params, fc_w, fc_b)
    # bf16 weights/activations with f32 accumulation -> small numeric delta vs f32 ref.
    assert jnp.allclose(logits, ref, atol=1e-2, rtol=1e-2), (
        jnp.max(jnp.abs(logits - ref)))

    print("KERNEL_OK")
</pallas_src>

<mosaic_0001>
module attributes {stable_mosaic.version = 11 : i64} {
  func.func @_convtext_kernel(%arg0: i32, %arg1: memref<8x20x32xbf16, #tpu.memory_space<vmem>>, %arg2: memref<5x32x128xbf16, #tpu.memory_space<vmem>>, %arg3: memref<16x128xf32, #tpu.memory_space<vmem>>, %arg4: memref<128x128xbf16, #tpu.memory_space<vmem>>, %arg5: memref<1x128xf32, #tpu.memory_space<vmem>>, %arg6: memref<8x128xf32, #tpu.memory_space<vmem>>) attributes {dimension_semantics = [#tpu.dimension_semantics<parallel>], iteration_bounds = array<i64: 1>, scalar_prefetch = 0 : i64, scratch_operands = 0 : i64, tpu.core_type = #tpu.core_type<tc>, window_params = [{transform_indices = @transform_0, window_bounds = array<i64: 8, 20, 32>}, {pipeline_mode = #tpu.pipeline_mode<synchronous>, transform_indices = @transform_1, window_bounds = array<i64: 5, 32, 128>}, {pipeline_mode = #tpu.pipeline_mode<synchronous>, transform_indices = @transform_2, window_bounds = array<i64: 16, 128>}, {pipeline_mode = #tpu.pipeline_mode<synchronous>, transform_indices = @transform_3, window_bounds = array<i64: 128, 128>}, {pipeline_mode = #tpu.pipeline_mode<synchronous>, transform_indices = @transform_4, window_bounds = array<i64: 1, 128>}, {transform_indices = @transform_5, window_bounds = array<i64: 8, 128>}]} {
    %c0 = arith.constant 0 : index
    %c0_0 = arith.constant 0 : index
    %c0_1 = arith.constant 0 : index
    %0 = vector.load %arg1[%c0, %c0_0, %c0_1] : memref<8x20x32xbf16, #tpu.memory_space<vmem>>, vector<8x16x32xbf16>
    %1 = vector.shape_cast %0 : vector<8x16x32xbf16> to vector<128x32xbf16>
    %c0_2 = arith.constant 0 : index
    %c0_3 = arith.constant 0 : index
    %c0_4 = arith.constant 0 : index
    %2 = vector.load %arg2[%c0_2, %c0_3, %c0_4] : memref<5x32x128xbf16, #tpu.memory_space<vmem>>, vector<1x32x128xbf16>
    %3 = vector.shape_cast %2 : vector<1x32x128xbf16> to vector<32x128xbf16>
    %cst = arith.constant dense<0.000000e+00> : vector<128x128xf32>
    %4 = tpu.matmul %1, %3, %cst {dimension_numbers = #tpu.dot_dimension_numbers<[1], [0], [0], [1], [0, 0, 1, 1], [], []>} : vector<128x32xbf16>, vector<32x128xbf16>, vector<128x128xf32> -> vector<128x128xf32>
    %c0_5 = arith.constant 0 : index
    %c1 = arith.constant 1 : index
    %c0_6 = arith.constant 0 : index
    %5 = vector.load %arg1[%c0_5, %c1, %c0_6] : memref<8x20x32xbf16, #tpu.memory_space<vmem>>, vector<8x16x32xbf16>
    %6 = vector.shape_cast %5 : vector<8x16x32xbf16> to vector<128x32xbf16>
    %c1_7 = arith.constant 1 : index
    %c0_8 = arith.constant 0 : index
    %c0_9 = arith.constant 0 : index
    %7 = vector.load %arg2[%c1_7, %c0_8, %c0_9] : memref<5x32x128xbf16, #tpu.memory_space<vmem>>, vector<1x32x128xbf16>
    %8 = vector.shape_cast %7 : vector<1x32x128xbf16> to vector<32x128xbf16>
    %cst_10 = arith.constant dense<0.000000e+00> : vector<128x128xf32>
    %9 = tpu.matmul %6, %8, %cst_10 {dimension_numbers = #tpu.dot_dimension_numbers<[1], [0], [0], [1], [0, 0, 1, 1], [], []>} : vector<128x32xbf16>, vector<32x128xbf16>, vector<128x128xf32> -> vector<128x128xf32>
    %10 = arith.addf %4, %9 : vector<128x128xf32>
    %c0_11 = arith.constant 0 : index
    %c2 = arith.constant 2 : index
    %c0_12 = arith.constant 0 : index
    %11 = vector.load %arg1[%c0_11, %c2, %c0_12] : memref<8x20x32xbf16, #tpu.memory_space<vmem>>, vector<8x16x32xbf16>
    %12 = vector.shape_cast %11 : vector<8x16x32xbf16> to vector<128x32xbf16>
    %c2_13 = arith.constant 2 : index
    %c0_14 = arith.constant 0 : index
    %c0_15 = arith.constant 0 : index
    %13 = vector.load %arg2[%c2_13, %c0_14, %c0_15] : memref<5x32x128xbf16, #tpu.memory_space<vmem>>, vector<1x32x128xbf16>
    %14 = vector.shape_cast %13 : vector<1x32x128xbf16> to vector<32x128xbf16>
    %cst_16 = arith.constant dense<0.000000e+00> : vector<128x128xf32>
    %15 = tpu.matmul %12, %14, %cst_16 {dimension_numbers = #tpu.dot_dimension_numbers<[1], [0], [0], [1], [0, 0, 1, 1], [], []>} : vector<128x32xbf16>, vector<32x128xbf16>, vector<128x128xf32> -> vector<128x128xf32>
    %16 = arith.addf %10, %15 : vector<128x128xf32>
    %c0_17 = arith.constant 0 : index
    %c3 = arith.constant 3 : index
    %c0_18 = arith.constant 0 : index
    %17 = vector.load %arg1[%c0_17, %c3, %c0_18] : memref<8x20x32xbf16, #tpu.memory_space<vmem>>, vector<8x16x32xbf16>
    %18 = vector.shape_cast %17 : vector<8x16x32xbf16> to vector<128x32xbf16>
    %c3_19 = arith.constant 3 : index
    %c0_20 = arith.constant 0 : index
    %c0_21 = arith.constant 0 : index
    %19 = vector.load %arg2[%c3_19, %c0_20, %c0_21] : memref<5x32x128xbf16, #tpu.memory_space<vmem>>, vector<1x32x128xbf16>
    %20 = vector.shape_cast %19 : vector<1x32x128xbf16> to vector<32x128xbf16>
    %cst_22 = arith.constant dense<0.000000e+00> : vector<128x128xf32>
    %21 = tpu.matmul %18, %20, %cst_22 {dimension_numbers = #tpu.dot_dimension_numbers<[1], [0], [0], [1], [0, 0, 1, 1], [], []>} : vector<128x32xbf16>, vector<32x128xbf16>, vector<128x128xf32> -> vector<128x128xf32>
    %22 = arith.addf %16, %21 : vector<128x128xf32>
    %c0_23 = arith.constant 0 : index
    %c4 = arith.constant 4 : index
    %c0_24 = arith.constant 0 : index
    %23 = vector.load %arg1[%c0_23, %c4, %c0_24] : memref<8x20x32xbf16, #tpu.memory_space<vmem>>, vector<8x16x32xbf16>
    %24 = vector.shape_cast %23 : vector<8x16x32xbf16> to vector<128x32xbf16>
    %c4_25 = arith.constant 4 : index
    %c0_26 = arith.constant 0 : index
    %c0_27 = arith.constant 0 : index
    %25 = vector.load %arg2[%c4_25, %c0_26, %c0_27] : memref<5x32x128xbf16, #tpu.memory_space<vmem>>, vector<1x32x128xbf16>
    %26 = vector.shape_cast %25 : vector<1x32x128xbf16> to vector<32x128xbf16>
    %cst_28 = arith.constant dense<0.000000e+00> : vector<128x128xf32>
    %27 = tpu.matmul %24, %26, %cst_28 {dimension_numbers = #tpu.dot_dimension_numbers<[1], [0], [0], [1], [0, 0, 1, 1], [], []>} : vector<128x32xbf16>, vector<32x128xbf16>, vector<128x128xf32> -> vector<128x128xf32>
    %28 = arith.addf %22, %27 : vector<128x128xf32>
    %29 = vector.shape_cast %28 : vector<128x128xf32> to vector<8x16x128xf32>
    %c0_29 = arith.constant 0 : index
    %c0_30 = arith.constant 0 : index
    %30 = vector.load %arg3[%c0_29, %c0_30] : memref<16x128xf32, #tpu.memory_space<vmem>>, vector<16x128xf32>
    %31 = vector.shape_cast %30 : vector<16x128xf32> to vector<1x16x128xf32>
    %32 = vector.broadcast %31 : vector<1x16x128xf32> to vector<8x16x128xf32>
    %33 = arith.addf %29, %32 : vector<8x16x128xf32>
    %cst_31 = arith.constant 0.000000e+00 : f32
    %34 = vector.broadcast %cst_31 : f32 to vector<8x16x128xf32>
    %35 = arith.maximumf %33, %34 : vector<8x16x128xf32>
    %cst_32 = arith.constant dense<0xFF800000> : vector<8x128xf32>
    %36 = vector.multi_reduction <maximumf>, %35, %cst_32 [1] : vector<8x16x128xf32> to vector<8x128xf32>
    %37 = arith.truncf %36 : vector<8x128xf32> to vector<8x128xbf16>
    %c0_33 = arith.constant 0 : index
    %c0_34 = arith.constant 0 : index
    %38 = vector.load %arg4[%c0_33, %c0_34] : memref<128x128xbf16, #tpu.memory_space<vmem>>, vector<128x128xbf16>
    %cst_35 = arith.constant dense<0.000000e+00> : vector<8x128xf32>
    %39 = tpu.matmul %37, %38, %cst_35 {dimension_numbers = #tpu.dot_dimension_numbers<[1], [0], [0], [1], [0, 0, 1, 1], [], []>} : vector<8x128xbf16>, vector<128x128xbf16>, vector<8x128xf32> -> vector<8x128xf32>
    %c0_36 = arith.constant 0 : index
    %c0_37 = arith.constant 0 : index
    %40 = vector.load %arg5[%c0_36, %c0_37] : memref<1x128xf32, #tpu.memory_space<vmem>>, vector<1x128xf32>
    %41 = vector.broadcast %40 : vector<1x128xf32> to vector<8x128xf32>
    %42 = arith.addf %39, %41 : vector<8x128xf32>
    %c0_38 = arith.constant 0 : index
    %c0_39 = arith.constant 0 : index
    %43 = vector.load %arg6[%c0_38, %c0_39] : memref<8x128xf32, #tpu.memory_space<vmem>>, vector<8x128xf32>
    tpu.vector_store %arg6[%c0_38, %c0_39], %42 {strides = array<i32>} : memref<8x128xf32, #tpu.memory_space<vmem>>, vector<8x128xf32>,
    return
  }
  func.func @transform_0(%arg0: i32) -> (i32, i32, i32) {
    %c0_i32 = arith.constant 0 : i32
    %c0_i32_0 = arith.constant 0 : i32
    %c0_i32_1 = arith.constant 0 : i32
    return %arg0, %c0_i32, %c0_i32_0 : i32, i32, i32
  }
  func.func @transform_1(%arg0: i32) -> (i32, i32, i32) {
    %c0_i32 = arith.constant 0 : i32
    %c0_i32_0 = arith.constant 0 : i32
    %c0_i32_1 = arith.constant 0 : i32
    %c0_i32_2 = arith.constant 0 : i32
    return %c0_i32, %c0_i32_0, %c0_i32_1 : i32, i32, i32
  }
  func.func @transform_2(%arg0: i32) -> (i32, i32) {
    %c0_i32 = arith.constant 0 : i32
    %c0_i32_0 = arith.constant 0 : i32
    %c0_i32_1 = arith.constant 0 : i32
    return %c0_i32, %c0_i32_0 : i32, i32
  }
  func.func @transform_3(%arg0: i32) -> (i32, i32) {
    %c0_i32 = arith.constant 0 : i32
    %c0_i32_0 = arith.constant 0 : i32
    %c0_i32_1 = arith.constant 0 : i32
    return %c0_i32, %c0_i32_0 : i32, i32
  }
  func.func @transform_4(%arg0: i32) -> (i32, i32) {
    %c0_i32 = arith.constant 0 : i32
    %c0_i32_0 = arith.constant 0 : i32
    %c0_i32_1 = arith.constant 0 : i32
    return %c0_i32, %c0_i32_0 : i32, i32
  }
  func.func @transform_5(%arg0: i32) -> (i32, i32) {
    %c0_i32 = arith.constant 0 : i32
    %c0_i32_0 = arith.constant 0 : i32
    return %arg0, %c0_i32 : i32, i32
  }
}

</mosaic_0001>

<bundles_post_ra>
// kernel: tpu_custom_call.1
= control target key start
LH: loop header
LB: loop body
LE: loop exit
PB: predicated region body
PF: predicated region fallthrough
CT: control target
= control target key end

     0   :  { %vm605_vm0 = vcmask 1042432   ;;  %vm606_vm1 = vcmask 1046532   ;;  %vm286_vm2 = vcmask 261120   ;;  %vm50_vm4 = vsmask.f32 3328  ;;  %s2885_s0 = inlined_call_operand.vmem [shape: bf16[8,20,32], index: 0, kind: input, shape index: {}]   ;;  %s2886_s1 = inlined_call_operand.vmem [shape: bf16[5,32,128], index: 1, kind: input, shape index: {}]   ;;  %s2887_s2 = inlined_call_operand.vmem [shape: f32[16,128], index: 2, kind: input, shape index: {}]   ;;  %s2888_s3 = inlined_call_operand.vmem [shape: bf16[128,128], index: 3, kind: input, shape index: {}]   ;;  %s2889_s4 = inlined_call_operand.vmem [shape: f32[1,128], index: 4, kind: input, shape index: {}]   ;;  %s2890_s5 = inlined_call_operand.hbm [shape: f32[8,128], index: 5, kind: output, shape index: {}]  }
   0x1   :  { %v2109_v0 = vld [vmem:[%s2886_s1 + $0x20] sm:$0xff]   ;;  %v2110_v1 = vld [vmem:[%s2886_s1 + $0x10] sm:$0xff]   ;;  %v2111_v2 = vld [vmem:[%s2886_s1 + $0x28] sm:$0xff]   ;;  %vm51_vm5 = vsmask.f32 7440 }
   0x2   :  { %1962 = vmatprep.subr.bf16.mxu0 %v2109_v0  ;;  %1922 = vmatprep.subr.bf16.mxu1 %v2110_v1  ;;  %v2112_v3 = vld [vmem:[%s2886_s1 + $0x18] sm:$0xff]   ;;  %v2207_v4 = vld [vmem:[%s2885_s0 + $0x4] sm:$0xf]  ;;  %v42_v5 = vld [vmem:[%s2885_s0 + $0x8] sm:$0x1] }
   0x3   :  { %1963 = vmatpush3.bf16.msra.mxu0 %v2109_v0  ;;  %1923 = vmatpush3.bf16.msra.mxu1 %v2110_v1  ;;  %v581_v6 = vld [vmem:[%s2885_s0] sm:$0xe]  ;;  %vm2215_vm3 = vmor %vm605_vm0, %vm606_vm1  ;;  %v610_v9 = vrot.slane %v2207_v4, 5  ;;  %v613_v10 = vrot.slane %v42_v5, 5  ;;  %v2223_v12 = vld [vmem:[%s2885_s0 + $0x10] sm:$0xf] }
   0x4   :  { %1964 = vmatprep.subr.bf16.mxu0 %v2111_v2  ;;  %1924 = vmatprep.subr.bf16.mxu1 %v2112_v3  ;;  %v1772_v8 = vrot.slane %v581_v6, 9  ;;  %v854_v11 = vshrl.u32 %v581_v6, 16  ;;  %v857_v13 = vshll.u32 %v581_v6, 16  ;;  %v2228_v14 = vld [vmem:[%s2885_s0 + $0x14] sm:$0x1]  ;;  %v617_v16 = vrot.slane %v2223_v12, 5  ;;  %vm2300_vm6 = vmor %vm50_vm4, %vm51_vm5 }
   0x5   :  { %v582_v15 = vld [vmem:[%s2885_s0 + $0xc] sm:$0xe]  ;;  %v612_v18 = vrot.slane %v610_v9, 4  ;;  %v2113_v21 = vld [vmem:[%s2886_s1 + $0x30] sm:$0xff]   ;;  %v620_v24 = vrot.slane %v2228_v14, 5  ;;  %v2263_v34 = vld [vmem:[%s2886_s1] sm:$0xff]  }
   0x6   :  { %v611_v17 = vsel %vm2215_vm3, %v1772_v8, %v610_v9  ;;  %v2236_v19 = vrot.slane %v854_v11, 5  ;;  %v1773_v20 = vrot.slane %v582_v15, 9  ;;  %v2241_v22 = vrot.slane %v857_v13, 6  ;;  %v2251_v29 = vld [vmem:[%s2885_s0] sm:$0xf]  ;;  %v2114_v39 = vld [vmem:[%s2886_s1 + $0x38] sm:$0xff]  }
   0x7   :  { %1965 = vmatpush3.bf16.msra.mxu0 %v2111_v2  ;;  %1925 = vmatpush3.bf16.msra.mxu1 %v2112_v3  ;;  %v619_v23 = vrot.slane %v617_v16, 4  ;;  %v877_v25 = vshrl.u32 %v582_v15, 16  ;;  %v614_v26 = vsel %vm2215_vm3, %v612_v18, %v613_v10  ;;  %v880_v28 = vshll.u32 %v582_v15, 16  ;;  %v2258_v33 = vld [vmem:[%s2885_s0 + $0xc] sm:$0xf]  ;;  %v2296_v58 = vld [vmem:[%s2886_s1 + $0x40] sm:$0xff]  }
   0x8   :  { %v618_v27 = vsel %vm2215_vm3, %v1773_v20, %v617_v16  ;;  %1982 = vmatprep.subr.bf16.mxu0 %v2113_v21  ;;  %v1784_v30 = vcombine.low %v611_v17, %v614_v26  ;;  %v54_v37 = vshrl.u32 %v2251_v29, 16  ;;  %v57_v38 = vshll.u32 %v2251_v29, 16  ;;  %1942 = vmatprep.subr.bf16.mxu1 %v2263_v34  ;;  %v2280_v48 = vld [vmem:[%s2885_s0 + $0x1c] sm:$0xf]  ;;  %v2287_v53 = vld [vmem:[%s2885_s0 + $0x18] sm:$0xe] }
   0x9   :  { %v621_v31 = vsel %vm2215_vm3, %v619_v23, %v620_v24  ;;  %v879_v32 = vrot.slane %v877_v25, 5  ;;  %v882_v36 = vrot.slane %v880_v28, 6  ;;  %v63_v40 = vshll.u32 %v2207_v4, 16  ;;  %v44_v2 = vld [vmem:[%s2885_s0 + $0x20] sm:$0x1] }
   0xa   :  { %v1785_v35 = vcombine.low %v618_v27, %v621_v31  ;;  %1966 = vmatprep.mubr.msk.bf16.mxu0 %vm286_vm2, %v1784_v30  ;;  %v67_v41 = vshrl.u32 %v2207_v4, 16  ;;  %v73_v42 = vshll.u32 %v42_v5, 16  ;;  %v78_v43 = vshrl.u32 %v2258_v33, 16  ;;  %v2315_v11 = vld [vmem:[%s2885_s0 + $0x28] sm:$0xf] }
   0xb   :  { %v883_v44 = vor.u32 %v882_v36, %v879_v32  ;;  %v56_v45 = vrot.slane %v54_v37, 4  ;;  %v59_v46 = vrot.slane %v57_v38, 5  ;;  %v81_v47 = vshll.u32 %v2258_v33, 16  ;;  %v2322_v17 = vld [vmem:[%s2885_s0 + $0x24] sm:$0xe] }
   0xc   :  { %1967 = vmatmul.mubr.msk.bf16.vlgmr.msra.gmra.mrb[0].mxu0 %vm286_vm2, %v1785_v35  ;;  %v65_v49 = vrot.slane %v63_v40, 5  ;;  %v69_v50 = vrot.slane %v67_v41, 4  ;;  %v75_v51 = vrot.slane %v73_v42, 5  ;;  %v2282_v52 = vrot.slane %v67_v41, 5  ;;  %v45_v24 = vld [vmem:[%s2885_s0 + $0x2c] sm:$0x1] }
   0xd   :  { %1983 = vmatpush3.bf16.msra.mxu0 %v2113_v21  ;;  %v2289_v54 = vrot.slane %v883_v44, 4  ;;  %v60_v55 = vor.u32 %v59_v46, %v56_v45  ;;  %v2291_v56 = vrot.slane %v63_v40, 6  ;;  %v80_v57 = vrot.slane %v78_v43, 4  ;;  %v2335_v25 = vld [vmem:[%s2885_s0 + $0x18] sm:$0xf] }
   0xe   :  { %1984 = vmatprep.subr.bf16.mxu0 %v2114_v39  ;;  %v70_v60 = vor.u32 %v69_v50, %v65_v49  ;;  %v83_v61 = vrot.slane %v81_v47, 5  ;;  %v87_v62 = vshll.u32 %v2223_v12, 16  ;;  %v91_v63 = vshrl.u32 %v2223_v12, 16  ;;  %v2346_v37 = vld [vmem:[%s2885_s0 + $0x24] sm:$0xf] }
   0xf   :  { %v61_v0 = vrot.slane %v60_v55, 4  ;;  %v97_v1 = vshll.u32 %v2228_v14, 16  ;;  %v1774_v3 = vrot.slane %v2287_v53, 9  ;;  %v624_v5 = vrot.slane %v2280_v48, 5 }
  0x10   :  { %v71_v6 = vrot.slane %v70_v60, 4  ;;  %v84_v8 = vor.u32 %v83_v61, %v80_v57  ;;  %v89_v9 = vrot.slane %v87_v62, 5  ;;  %v93_v10 = vrot.slane %v91_v63, 4 }
  0x11   :  { %1985 = vmatpush3.bf16.msra.mxu0 %v2114_v39  ;;  %v66_v13 = vsel %vm2300_vm6, %v61_v0, %v65_v49  ;;  %v99_v14 = vrot.slane %v97_v1, 5  ;;  %v885_v15 = vrot.slane %v91_v63, 5  ;;  %v886_v16 = vrot.slane %v87_v62, 6  ;;  %v2370_v62 = vld [vmem:[%s2885_s0 + $0x34] sm:$0xf] }
  0x12   :  { %2002 = vmatprep.subr.bf16.mxu0 %v2296_v58  ;;  %v76_v18 = vsel %vm2300_vm6, %v71_v6, %v75_v51  ;;  %v85_v20 = vrot.slane %v84_v8, 4  ;;  %v94_v21 = vor.u32 %v93_v10, %v89_v9  ;;  %v625_v23 = vsel %vm2215_vm3, %v1774_v3, %v624_v5  ;;  %v2116_v51 = vld [vmem:[%s2886_s1 + $0x8] sm:$0xff]   ;;  %v46_v10 = vld [vmem:[%s2885_s0 + $0x38] sm:$0x1] }
  0x13   :  { %v1736_v26 = vcombine.low %v66_v13, %v76_v18  ;;  %v2337_v27 = vor.u32 %v886_v16, %v885_v15  ;;  %v626_v28 = vrot.slane %v624_v5, 4  ;;  %v627_v30 = vrot.slane %v44_v2, 5  ;;  %v2393_v18 = vld [vmem:[%s2885_s0 + $0x40] sm:$0xf] }
  0x14   :  { %v90_v31 = vsel %vm2300_vm6, %v85_v20, %v89_v9  ;;  %v95_v32 = vrot.slane %v94_v21, 4  ;;  %v1775_v35 = vrot.slane %v2322_v17, 9  ;;  %v631_v36 = vrot.slane %v2315_v11, 5 }
  0x15   :  { %1926 = vmatprep.mubr.msk.bf16.mxu1 %vm286_vm2, %v1736_v26  ;;  %v889_v38 = vrot.slane %v2337_v27, 4  ;;  %v628_v39 = vsel %vm2215_vm3, %v626_v28, %v627_v30  ;;  %v634_v40 = vrot.slane %v45_v24, 5  ;;  %v102_v41 = vshrl.u32 %v2335_v25, 16  ;;  %v2402_v26 = vld [vmem:[%s2885_s0 + $0x3c] sm:$0xe] }
  0x16   :  { %v100_v42 = vsel %vm2300_vm6, %v95_v32, %v99_v14  ;;  %v1786_v43 = vcombine.low %v625_v23, %v628_v39  ;;  %v632_v44 = vsel %vm2215_vm3, %v1775_v35, %v631_v36  ;;  %v633_v45 = vrot.slane %v631_v36, 4  ;;  %v47_v32 = vld [vmem:[%s2885_s0 + $0x44] sm:$0x1] }
  0x17   :  { %v1737_v46 = vcombine.low %v90_v31, %v100_v42  ;;  %v104_v47 = vrot.slane %v102_v41, 4  ;;  %v105_v49 = vshll.u32 %v2335_v25, 16  ;;  %v111_v50 = vshll.u32 %v2280_v48, 16 }
  0x18   :  { %1970 = vmatprep.mubr.msk.bf16.mxu0 %vm286_vm2, %v1786_v43  ;;  %v635_v55 = vsel %vm2215_vm3, %v633_v45, %v634_v40  ;;  %v115_v57 = vshrl.u32 %v2280_v48, 16  ;;  %v121_v60 = vshll.u32 %v44_v2, 16  ;;  %v126_v61 = vshrl.u32 %v2346_v37, 16  ;;  %v2379_v2 = vld [vmem:[%s2885_s0 + $0x30] sm:$0xe] }
  0x19   :  { %1927 = vmatmul.mubr.msk.bf16.vlgmr.msra.gmra.mrb[0].mxu1 %vm286_vm2, %v1737_v46  ;;  %v1787_v63 = vcombine.low %v632_v44, %v635_v55  ;;  %v107_v0 = vrot.slane %v105_v49, 5  ;;  %v113_v1 = vrot.slane %v111_v50, 5  ;;  %v129_v3 = vshll.u32 %v2346_v37, 16  ;;  %v2417_v45 = vld [vmem:[%s2885_s0 + $0x30] sm:$0xf] }
  0x1a   :  { %v117_v5 = vrot.slane %v115_v57, 4  ;;  %v123_v6 = vrot.slane %v121_v60, 5  ;;  %v128_v8 = vrot.slane %v126_v61, 4  ;;  %v135_v9 = vshll.u32 %v2315_v11, 16  ;;  %1943 = vmatpush3.bf16.msra.mxu1 %v2263_v34 }
  0x1b   :  { %1971 = vmatmul.mubr.msk.bf16.gmra.mrb[4].mxu0 %vm286_vm2, %v1787_v63  ;;  %v108_v13 = vor.u32 %v107_v0, %v104_v47  ;;  %v131_v14 = vrot.slane %v129_v3, 5  ;;  %v139_v15 = vshrl.u32 %v2315_v11, 16  ;;  %v145_v16 = vshll.u32 %v45_v24, 16  ;;  %1944 = vmatprep.subr.bf16.mxu1 %v2116_v51 }
  0x1c   :  { %v118_v20 = vor.u32 %v117_v5, %v113_v1  ;;  %v137_v21 = vrot.slane %v135_v9, 5  ;;  %v1776_v23 = vrot.slane %v2379_v2, 9  ;;  %v638_v34 = vrot.slane %v2370_v62, 5 }
  0x1d   :  { %v109_v24 = vrot.slane %v108_v13, 4  ;;  %v132_v28 = vor.u32 %v131_v14, %v128_v8  ;;  %v141_v30 = vrot.slane %v139_v15, 4  ;;  %v147_v31 = vrot.slane %v145_v16, 5 }
  0x1e   :  { %v119_v35 = vrot.slane %v118_v20, 4  ;;  %v639_v36 = vsel %vm2215_vm3, %v1776_v23, %v638_v34  ;;  %v640_v39 = vrot.slane %v638_v34, 4  ;;  %v641_v40 = vrot.slane %v46_v10, 5  ;;  %1945 = vmatpush3.bf16.msra.mxu1 %v2116_v51 }
  0x1f   :  { %v114_v41 = vsel %vm2300_vm6, %v109_v24, %v113_v1  ;;  %v133_v42 = vrot.slane %v132_v28, 4  ;;  %v142_v43 = vor.u32 %v141_v30, %v137_v21  ;;  %v1777_v44 = vrot.slane %v2402_v26, 9  ;;  %v2446_v24 = vld [vmem:[%s2885_s0 + $0x48] sm:$0xe] }
  0x20   :  { %v124_v46 = vsel %vm2300_vm6, %v119_v35, %v123_v6  ;;  %v642_v47 = vsel %vm2215_vm3, %v640_v39, %v641_v40  ;;  %v645_v49 = vrot.slane %v2393_v18, 5  ;;  %v648_v51 = vrot.slane %v47_v32, 5  ;;  %v2433_v6 = vld [vmem:[%s2885_s0 + $0x3c] sm:$0xf] }
  0x21   :  { %v1738_v55 = vcombine.low %v114_v41, %v124_v46  ;;  %v138_v60 = vsel %vm2300_vm6, %v133_v42, %v137_v21  ;;  %v143_v61 = vrot.slane %v142_v43, 4  ;;  %v1788_v63 = vcombine.low %v639_v36, %v642_v47  ;;  %v48_v42 = vld [vmem:[%s2885_s0 + $0x50] sm:$0x1] }
  0x22   :  { %v646_v0 = vsel %vm2215_vm3, %v1777_v44, %v645_v49  ;;  %v647_v1 = vrot.slane %v645_v49, 4  ;;  %v150_v3 = vshrl.u32 %v2417_v45, 16  ;;  %v153_v5 = vshll.u32 %v2417_v45, 16  ;;  %v2470_v49 = vld [vmem:[%s2885_s0 + $0x58] sm:$0xf] }
  0x23   :  { %1930 = vmatprep.mubr.msk.bf16.mxu1 %vm286_vm2, %v1738_v55  ;;  %v148_v8 = vsel %vm2300_vm6, %v143_v61, %v147_v31  ;;  %1974 = vmatprep.mubr.msk.bf16.mxu0 %vm286_vm2, %v1788_v63  ;;  %v159_v13 = vshll.u32 %v2370_v62, 16  ;;  %v163_v14 = vshrl.u32 %v2370_v62, 16  ;;  %v169_v16 = vshll.u32 %v46_v10, 16  ;;  %v2455_v10 = vld [vmem:[%s2885_s0 + $0x4c] sm:$0xf] }
  0x24   :  { %v1739_v20 = vcombine.low %v138_v60, %v148_v8  ;;  %v649_v21 = vsel %vm2215_vm3, %v647_v1, %v648_v51  ;;  %v152_v23 = vrot.slane %v150_v3, 4  ;;  %v155_v34 = vrot.slane %v153_v5, 5  ;;  %v2475_v51 = vld [vmem:[%s2885_s0 + $0x5c] sm:$0x1]  ;;  %v2480_v55 = vld [vmem:[%s2885_s0 + $0x54] sm:$0xe] }
  0x25   :  { %v1789_v28 = vcombine.low %v646_v0, %v649_v21  ;;  %v161_v30 = vrot.slane %v159_v13, 5  ;;  %v165_v31 = vrot.slane %v163_v14, 4  ;;  %v171_v35 = vrot.slane %v169_v16, 5 }
  0x26   :  { %1931 = vmatmul.mubr.msk.bf16.gmra.mrb[4].mxu1 %vm286_vm2, %v1739_v20  ;;  %v156_v36 = vor.u32 %v155_v34, %v152_v23  ;;  %v174_v39 = vshrl.u32 %v2433_v6, 16  ;;  %v177_v40 = vshll.u32 %v2433_v6, 16  ;;  %v183_v41 = vshll.u32 %v2393_v18, 16  ;;  %v2493_v23 = vld [vmem:[%s2885_s0 + $0x48] sm:$0xf] }
  0x27   :  { %1975 = vmatmul.mubr.msk.bf16.gmra.mrb[8].mxu0 %vm286_vm2, %v1789_v28  ;;  %v166_v43 = vor.u32 %v165_v31, %v161_v30  ;;  %v187_v44 = vshrl.u32 %v2393_v18, 16  ;;  %v193_v46 = vshll.u32 %v47_v32, 16  ;;  %v1778_v47 = vrot.slane %v2446_v24, 9 }
  0x28   :  { %v157_v60 = vrot.slane %v156_v36, 4  ;;  %v176_v61 = vrot.slane %v174_v39, 4  ;;  %v179_v32 = vrot.slane %v177_v40, 5  ;;  %v185_v63 = vrot.slane %v183_v41, 5 }
  0x29   :  { %v167_v0 = vrot.slane %v166_v43, 4  ;;  %v189_v1 = vrot.slane %v187_v44, 4  ;;  %v195_v3 = vrot.slane %v193_v46, 5  ;;  %v652_v5 = vrot.slane %v2455_v10, 5 }
  0x2a   :  { %v162_v8 = vsel %vm2300_vm6, %v157_v60, %v161_v30  ;;  %v180_v16 = vor.u32 %v179_v32, %v176_v61  ;;  %v655_v20 = vrot.slane %v48_v42, 5  ;;  %v1779_v21 = vrot.slane %v2480_v55, 9 }
  0x2b   :  { %v172_v34 = vsel %vm2300_vm6, %v167_v0, %v171_v35  ;;  %v190_v28 = vor.u32 %v189_v1, %v185_v63  ;;  %v653_v31 = vsel %vm2215_vm3, %v1778_v47, %v652_v5  ;;  %v654_v36 = vrot.slane %v652_v5, 4  ;;  %v2513_v5 = vld [vmem:[%s2885_s0 + $0x54] sm:$0xf] }
  0x2c   :  { %v1740_v39 = vcombine.low %v162_v8, %v172_v34  ;;  %v181_v40 = vrot.slane %v180_v16, 4  ;;  %v659_v30 = vrot.slane %v2470_v49, 5  ;;  %v662_v43 = vrot.slane %v2475_v51, 5 }
  0x2d   :  { %v191_v46 = vrot.slane %v190_v28, 4  ;;  %v656_v60 = vsel %vm2215_vm3, %v654_v36, %v655_v20  ;;  %v198_v61 = vshrl.u32 %v2493_v23, 16  ;;  %v201_v32 = vshll.u32 %v2493_v23, 16 }
  0x2e   :  { %1934 = vmatprep.mubr.msk.bf16.mxu1 %vm286_vm2, %v1740_v39  ;;  %v186_v35 = vsel %vm2300_vm6, %v181_v40, %v185_v63  ;;  %v1790_v47 = vcombine.low %v653_v31, %v656_v60  ;;  %v660_v0 = vsel %vm2215_vm3, %v1779_v21, %v659_v30  ;;  %v661_v1 = vrot.slane %v659_v30, 4 }
  0x2f   :  { %v196_v8 = vsel %vm2300_vm6, %v191_v46, %v195_v3  ;;  %v200_v16 = vrot.slane %v198_v61, 4  ;;  %v203_v20 = vrot.slane %v201_v32, 5  ;;  %v207_v34 = vshll.u32 %v2455_v10, 16 }
  0x30   :  { %v1741_v28 = vcombine.low %v186_v35, %v196_v8  ;;  %1978 = vmatprep.mubr.msk.bf16.mxu0 %vm286_vm2, %v1790_v47  ;;  %v663_v63 = vsel %vm2215_vm3, %v661_v1, %v662_v43  ;;  %v211_v21 = vshrl.u32 %v2455_v10, 16  ;;  %v217_v31 = vshll.u32 %v48_v42, 16  ;;  %v2533_v42 = vld [vmem:[%s2885_s0 + $0x8] sm:$0x3] }
  0x31   :  { %v1791_v36 = vcombine.low %v660_v0, %v663_v63  ;;  %v204_v39 = vor.u32 %v203_v20, %v200_v16  ;;  %v209_v40 = vrot.slane %v207_v34, 5  ;;  %v222_v3 = vshrl.u32 %v2513_v5, 16 }
  0x32   :  { %1935 = vmatmul.mubr.msk.bf16.gmra.mrb[8].mxu1 %vm286_vm2, %v1741_v28  ;;  %v213_v30 = vrot.slane %v211_v21, 4  ;;  %v219_v46 = vrot.slane %v217_v31, 5  ;;  %v225_v60 = vshll.u32 %v2513_v5, 16  ;;  %v2891_v7 = vshll.u32 %v2470_v49, 16  ;;  %v2547_v28 = vld [vmem:[%s2885_s0 + $0x14] sm:$0x3] }
  0x33   :  { %1979 = vmatmul.mubr.msk.bf16.gmra.mrb[12].mxu0 %vm286_vm2, %v1791_v36  ;;  %v205_v43 = vrot.slane %v204_v39, 4  ;;  %v224_v61 = vrot.slane %v222_v3, 4  ;;  %v235_v32 = vshrl.u32 %v2470_v49, 16  ;;  %v241_v35 = vshll.u32 %v2475_v51, 16 }
  0x34   :  { %v214_v47 = vor.u32 %v213_v30, %v209_v40  ;;  %v227_v0 = vrot.slane %v225_v60, 5  ;;  %v233_v1 = vrot.slane %v2891_v7, 5  ;;  %vm850_vm7 = vsmask.f32 2304 }
  0x35   :  { %v210_v8 = vsel %vm2300_vm6, %v205_v43, %v209_v40  ;;  %v237_v16 = vrot.slane %v235_v32, 4  ;;  %v243_v20 = vrot.slane %v241_v35, 5  ;;  %vm851_vm8 = vsmask.f32 6416 }
  0x36   :  { %v215_v51 = vrot.slane %v214_v47, 4  ;;  %v228_v63 = vor.u32 %v227_v0, %v224_v61  ;;  %vm2549_vm9 = vmor %vm850_vm7, %vm851_vm8  ;;  %v860_v36 = vor.u32 %v2241_v22, %v2236_v19  ;;  %v864_v39 = vor.u32 %v2291_v56, %v2282_v52 }
  0x37   :  { %v238_v40 = vor.u32 %v237_v16, %v233_v1  ;;  %v868_v3 = vshrl.u32 %v2533_v42, 16  ;;  %v871_v30 = vshll.u32 %v2533_v42, 16  ;;  %v888_v60 = vsel %vm2549_vm9, %v2289_v54, %v2337_v27 }
  0x38   :  { %v220_v43 = vsel %vm2300_vm6, %v215_v51, %v219_v46  ;;  %v229_v61 = vrot.slane %v228_v63, 4  ;;  %v861_v35 = vrot.slane %v860_v36, 4  ;;  %v866_v47 = vrot.slane %v864_v39, 4 }
  0x39   :  { %v1742_v19 = vcombine.low %v210_v8, %v220_v43  ;;  %v239_v22 = vrot.slane %v238_v40, 4  ;;  %v870_v0 = vrot.slane %v868_v3, 5  ;;  %v873_v52 = vrot.slane %v871_v30, 6 }
  0x3a   :  { %v234_v56 = vsel %vm2300_vm6, %v229_v61, %v233_v1  ;;  %v865_v16 = vsel %vm2549_vm9, %v861_v35, %v864_v39  ;;  %v891_v7 = vshrl.u32 %v2547_v28, 16  ;;  %v894_v54 = vshll.u32 %v2547_v28, 16  ;;  %v2581_v1 = vld [vmem:[%s2885_s0 + $0x20] sm:$0x3] }
  0x3b   :  { %1938 = vmatprep.mubr.msk.bf16.mxu1 %vm286_vm2, %v1742_v19  ;;  %v244_v46 = vsel %vm2300_vm6, %v239_v22, %v243_v20  ;;  %v874_v51 = vor.u32 %v873_v52, %v870_v0  ;;  %v1754_v8 = vcombine.low %v2251_v29, %v2207_v4  ;;  %v1755_v63 = vcombine.low %v2258_v33, %v2223_v12 }
  0x3c   :  { %10 = vsyncpa [#allocation3], 0  ;;  %v1743_v36 = vcombine.low %v234_v56, %v244_v46  ;;  %v893_v39 = vrot.slane %v891_v7, 5  ;;  %v896_v40 = vrot.slane %v894_v54, 6  ;;  %v900_v3 = vshrl.u32 %v2287_v53, 16  ;;  %s2161_s26 = smov [#allocation2]  }
  0x3d   :  { %v875_v59 = vsel %vm2549_vm9, %v866_v47, %v874_v51  ;;  %v903_v20 = vshll.u32 %v2287_v53, 16  ;;  %v908_v29 = vrot.slane %v115_v57, 5  ;;  %v909_v33 = vrot.slane %v111_v50, 6  ;;  %v2598_v53 = vld [vmem:[%s2885_s0 + $0x2c] sm:$0x3]  ;;  %s1724_s27 = sshll.u32 %s2161_s26, 4  ;;  %s1725_s27 = int_to_ptr.vmem [resolvable:$true] %s1724_s27 }
  0x3e   :  { %1939 = vmatmul.mubr.msk.bf16.gmra.mrb[12].mxu1 %vm286_vm2, %v1743_v36  ;;  %v1806_v30 = vcombine.low %v865_v16, %v875_v59  ;;  %v897_v43 = vor.u32 %v896_v40, %v893_v39  ;;  %v902_v61 = vrot.slane %v900_v3, 5  ;;  %v914_v7 = vshrl.u32 %v2581_v1, 16  ;;  %v2122_v51 = vld [vmem:[%s2886_s1 + $0x48] sm:$0xff]   ;;  %s2135_s28 = scalar_lea.vmem %s1725_s27, 128  ;;  %p2140_p1 = scmp.lt.s32.totalorder %s1725_s27, %s1725_s27 }
  0x3f   :  { %1946 = vmatprep.mubr.msk.bf16.mxu1 %vm286_vm2, %v1754_v8  ;;  %v905_v35 = vrot.slane %v903_v20, 6  ;;  %v910_v19 = vor.u32 %v909_v33, %v908_v29  ;;  %v917_v47 = vshll.u32 %v2581_v1, 16  ;;  %v923_v50 = vshrl.u32 %v2322_v17, 16  ;;  %p2136_p0 = scmp.ne.s32.totalorder %s1725_s27, %s2135_s28  ;;  %p2141_p2 = scmp.lt.s32.totalorder %s2135_s28, %s2135_s28 }
  0x40   :  { %1986 = vmatprep.mubr.msk.bf16.mxu0 %vm286_vm2, %v1806_v30  ;;  %v898_v57 = vsel %vm2549_vm9, %v889_v38, %v897_v43  ;;  %v916_v22 = vrot.slane %v914_v7, 5  ;;  %v926_v0 = vshll.u32 %v2322_v17, 16  ;;  %v931_v52 = vrot.slane %v139_v15, 5  ;;  %v2629_v30 = vld [vmem:[%s2885_s0 + $0x38] sm:$0x3] }
  0x41   :  { %v1807_v56 = vcombine.low %v888_v60, %v898_v57  ;;  %v906_v16 = vor.u32 %v905_v35, %v902_v61  ;;  %v912_v54 = vrot.slane %v910_v19, 4  ;;  %v919_v46 = vrot.slane %v917_v47, 6  ;;  %p2142_p3 = por %p2141_p2, %p2140_p1 }
  0x42   :  { %v925_v8 = vrot.slane %v923_v50, 5  ;;  %v928_v36 = vrot.slane %v926_v0, 6  ;;  %v932_v27 = vrot.slane %v135_v9, 6  ;;  %v937_v38 = vshrl.u32 %v2598_v53, 16 }
  0x43   :  { %1987 = vmatmul.mubr.msk.bf16.vlgmr.msra.gmra.mrb[0].mxu0 %vm286_vm2, %v1807_v56  ;;  %v907_v17 = vrot.slane %v906_v16, 4  ;;  %v920_v39 = vor.u32 %v919_v46, %v916_v22  ;;  %v940_v15 = vshll.u32 %v2598_v53, 16  ;;  %v1756_v60 = vcombine.low %v2335_v25, %v2280_v48  ;;  %p2143_p4 = pnand %p2142_p3, %p2136_p0 }
  0x44   :  { %2003 = vmatpush3.bf16.msra.mxu0 %v2296_v58  ;;  %v929_v40 = vor.u32 %v928_v36, %v925_v8  ;;  %v933_v3 = vor.u32 %v932_v27, %v931_v52  ;;  %v939_v59 = vrot.slane %v937_v38, 5  ;;  %v1757_v20 = vcombine.low %v2346_v37, %v2315_v11 }
  0x45   :  { %v911_v9 = vsel %vm2549_vm9, %v907_v17, %v910_v19  ;;  %v921_v29 = vsel %vm2549_vm9, %v912_v54, %v920_v39  ;;  %v942_v33 = vrot.slane %v940_v15, 6  ;;  %v946_v58 = vshrl.u32 %v2379_v2, 16  ;;  %2004 = vmatprep.subr.bf16.mxu0 %v2122_v51 }
  0x46   :  { %1947 = vmatmul.mubr.msk.bf16.vlgmr.msra.gmra.mrb[0].mxu1 %vm286_vm2, %v1755_v63  ;;  %v1808_v25 = vcombine.low %v911_v9, %v921_v29  ;;  %v930_v43 = vrot.slane %v929_v40, 4  ;;  %v935_v37 = vrot.slane %v933_v3, 4  ;;  %v949_v61 = vshll.u32 %v2379_v2, 16  ;;  %v2672_v29 = vld [vmem:[%s2885_s0 + $0x50] sm:$0x3] }
  0x47   :  { %v943_v7 = vor.u32 %v942_v33, %v939_v59  ;;  %1950 = vmatprep.mubr.msk.bf16.mxu1 %vm286_vm2, %v1756_v60  ;;  %v948_v35 = vrot.slane %v946_v58, 5  ;;  %v954_v19 = vrot.slane %v163_v14, 5  ;;  %v955_v47 = vrot.slane %v159_v13, 6  ;;  %v2649_v14 = vld [vmem:[%s2885_s0 + $0x44] sm:$0x3] }
  0x48   :  { %1990 = vmatprep.mubr.msk.bf16.mxu0 %vm286_vm2, %v1808_v25  ;;  %v934_v63 = vsel %vm2549_vm9, %v930_v43, %v933_v3  ;;  %v951_v50 = vrot.slane %v949_v61, 6  ;;  %v960_v57 = vshrl.u32 %v2629_v30, 16  ;;  %v963_v2 = vshll.u32 %v2629_v30, 16  ;;  %2005 = vmatpush3.bf16.msra.mxu0 %v2122_v51 }
  0x49   :  { %v944_v22 = vsel %vm2549_vm9, %v935_v37, %v943_v7  ;;  %v956_v0 = vor.u32 %v955_v47, %v954_v19  ;;  %v969_v13 = vshrl.u32 %v2402_v26, 16  ;;  %v972_v52 = vshll.u32 %v2402_v26, 16 }
  0x4a   :  { %v1809_v56 = vcombine.low %v934_v63, %v944_v22  ;;  %v952_v16 = vor.u32 %v951_v50, %v948_v35  ;;  %v962_v54 = vrot.slane %v960_v57, 5  ;;  %v965_v46 = vrot.slane %v963_v2, 6 }
  0x4b   :  { %v958_v8 = vrot.slane %v956_v0, 4  ;;  %v971_v36 = vrot.slane %v969_v13, 5  ;;  %v974_v51 = vrot.slane %v972_v52, 6  ;;  %v977_v27 = vrot.slane %v187_v44, 5 }
  0x4c   :  { %1991 = vmatmul.mubr.msk.bf16.gmra.mrb[4].mxu0 %vm286_vm2, %v1809_v56  ;;  %v953_v38 = vrot.slane %v952_v16, 4  ;;  %v966_v17 = vor.u32 %v965_v46, %v962_v54  ;;  %v978_v39 = vrot.slane %v183_v41, 6  ;;  %v983_v15 = vshrl.u32 %v2649_v14, 16 }
  0x4d   :  { %v975_v26 = vor.u32 %v974_v51, %v971_v36  ;;  %v986_v60 = vshll.u32 %v2649_v14, 16  ;;  %v1758_v40 = vcombine.low %v2417_v45, %v2370_v62  ;;  %v1759_v3 = vcombine.low %v2433_v6, %v2393_v18 }
  0x4e   :  { %1951 = vmatmul.mubr.msk.bf16.gmra.mrb[4].mxu1 %vm286_vm2, %v1757_v20  ;;  %v957_v44 = vsel %vm2549_vm9, %v953_v38, %v956_v0  ;;  %v967_v59 = vsel %vm2549_vm9, %v958_v8, %v966_v17  ;;  %v979_v41 = vor.u32 %v978_v39, %v977_v27  ;;  %v985_v9 = vrot.slane %v983_v15, 5  ;;  %v1215_v38 = vld [vmem:[%s2885_s0] sm:$0xc] }
  0x4f   :  { %vm1239_vm10 = vcmask 1041408   ;;  %v1810_v45 = vcombine.low %v957_v44, %v967_v59  ;;  %v976_v33 = vrot.slane %v975_v26, 4  ;;  %v988_v58 = vrot.slane %v986_v60, 6  ;;  %1954 = vmatprep.mubr.msk.bf16.mxu1 %vm286_vm2, %v1758_v40 }
  0x50   :  { %v992_v6 = vshrl.u32 %v2446_v24, 16  ;;  %v981_v20 = vrot.slane %v979_v41, 4  ;;  %v995_v25 = vshll.u32 %v2446_v24, 16  ;;  %v1000_v43 = vrot.slane %v211_v21, 5  ;;  %v2689_v24 = vld [vmem:[%s2885_s0 + $0x5c] sm:$0x3] }
  0x51   :  { %v1001_v37 = vrot.slane %v207_v34, 6  ;;  %1994 = vmatprep.mubr.msk.bf16.mxu0 %vm286_vm2, %v1810_v45  ;;  %v980_v61 = vsel %vm2549_vm9, %v976_v33, %v979_v41  ;;  %v989_v7 = vor.u32 %v988_v58, %v985_v9  ;;  %v1006_v19 = vshrl.u32 %v2672_v29, 16  ;;  %v2129_v41 = vld [vmem:[%s2888_s3 + $0x10] sm:$0xff]  }
  0x52   :  { %v994_v35 = vrot.slane %v992_v6, 5  ;;  %v997_v47 = vrot.slane %v995_v25, 6  ;;  %v1009_v50 = vshll.u32 %v2672_v29, 16  ;;  %v1015_v34 = vshrl.u32 %v2480_v55, 16 }
  0x53   :  { %v1002_v63 = vor.u32 %v1001_v37, %v1000_v43  ;;  %v990_v21 = vsel %vm2549_vm9, %v981_v20, %v989_v7  ;;  %v1008_v57 = vrot.slane %v1006_v19, 5  ;;  %v1018_v2 = vshll.u32 %v2480_v55, 16  ;;  %v1217_v20 = vld [vmem:[%s2885_s0 + $0x18] sm:$0xc] }
  0x54   :  { %v1023_v22 = vrot.slane %v235_v32, 5  ;;  %v1811_v0 = vcombine.low %v980_v61, %v990_v21  ;;  %v998_v13 = vor.u32 %v997_v47, %v994_v35  ;;  %v1011_v56 = vrot.slane %v1009_v50, 6 }
  0x55   :  { %v1004_v52 = vrot.slane %v1002_v63, 4  ;;  %v1017_v16 = vrot.slane %v1015_v34, 5  ;;  %v1020_v54 = vrot.slane %v1018_v2, 6  ;;  %v2898_v46 = vshll.u32 %v2470_v49, 16 }
  0x56   :  { %v1029_v36 = vshrl.u32 %v2689_v24, 16  ;;  %1995 = vmatmul.mubr.msk.bf16.gmra.mrb[8].mxu0 %vm286_vm2, %v1811_v0  ;;  %1955 = vmatmul.mubr.msk.bf16.gmra.mrb[8].mxu1 %vm286_vm2, %v1759_v3  ;;  %v999_v51 = vrot.slane %v998_v13, 4  ;;  %v1012_v55 = vor.u32 %v1011_v56, %v1008_v57  ;;  %v1032_v27 = vshll.u32 %v2689_v24, 16  ;;  %v1218_v57 = vld [vmem:[%s2885_s0 + $0x24] sm:$0xc] }
  0x57   :  { %v1024_v8 = vrot.slane %v2898_v46, 6  ;;  %v1760_v32 = vcombine.low %v2493_v23, %v2455_v10  ;;  %v1021_v17 = vor.u32 %v1020_v54, %v1017_v16  ;;  %vm1240_vm11 = vcmask 1045508   ;;  %v1216_v23 = vld [vmem:[%s2885_s0 + $0xc] sm:$0xc] }
  0x58   :  { %v1031_v15 = vrot.slane %v1029_v36, 5  ;;  %v1003_v26 = vsel %vm2549_vm9, %v999_v51, %v1002_v63  ;;  %v1013_v60 = vsel %vm2549_vm9, %v1004_v52, %v1012_v55  ;;  %v1034_v40 = vrot.slane %v1032_v27, 6  ;;  %vm2717_vm12 = vmor %vm1239_vm10, %vm1240_vm11  ;;  %v1221_v27 = vld [vmem:[%s2885_s0 + $0x48] sm:$0xc] }
  0x59   :  { %v1025_v39 = vor.u32 %v1024_v8, %v1023_v22  ;;  %1958 = vmatprep.mubr.msk.bf16.mxu1 %vm286_vm2, %v1760_v32  ;;  %v1812_v3 = vcombine.low %v1003_v26, %v1013_v60  ;;  %v1022_v44 = vrot.slane %v1021_v17, 4  ;;  %v1824_v9 = vrot.slane %v1215_v38, 10  ;;  %v1219_v22 = vld [vmem:[%s2885_s0 + $0x30] sm:$0xc] }
  0x5a   :  { %v1035_v45 = vor.u32 %v1034_v40, %v1031_v15  ;;  %v1761_v33 = vcombine.low %v2513_v5, %v2470_v49  ;;  %v1244_v58 = vrot.slane %v2207_v4, 6  ;;  %v1247_v6 = vrot.slane %v2533_v42, 6 }
  0x5b   :  { %v1027_v59 = vrot.slane %v1025_v39, 4  ;;  %1998 = vmatprep.mubr.msk.bf16.mxu0 %vm286_vm2, %v1812_v3  ;;  %v1026_v25 = vsel %vm2549_vm9, %v1022_v44, %v1025_v39  ;;  %v1825_v43 = vrot.slane %v1216_v23, 10  ;;  %v1251_v37 = vrot.slane %v2223_v12, 6 }
  0x5c   :  { %v1254_v61 = vrot.slane %v2547_v28, 6  ;;  %v1245_v4 = vsel %vm2717_vm12, %v1824_v9, %v1244_v58  ;;  %v1246_v42 = vrot.slane %v1244_v58, 4  ;;  %v1258_v7 = vrot.slane %v2280_v48, 6 }
  0x5d   :  { %v1036_v5 = vsel %vm2549_vm9, %v1027_v59, %v1035_v45  ;;  %v1253_v19 = vrot.slane %v1251_v37, 4  ;;  %v1826_v47 = vrot.slane %v1217_v20, 10  ;;  %v1261_v63 = vrot.slane %v2581_v1, 6  ;;  %v2127_v20 = vld [vmem:[%s2888_s3] sm:$0xff]  }
  0x5e   :  { %v1813_v35 = vcombine.low %v1026_v25, %v1036_v5  ;;  %1959 = vmatmul.mubr.msk.bf16.gmra.mrb[12].mxu1 %vm286_vm2, %v1761_v33  ;;  %v1248_v12 = vsel %vm2717_vm12, %v1246_v42, %v1247_v6  ;;  %v1260_v28 = vrot.slane %v1258_v7, 4  ;;  %v1252_v50 = vsel %vm2717_vm12, %v1825_v43, %v1251_v37  ;;  %v2130_v43 = vld [vmem:[%s2888_s3 + $0x18] sm:$0xff]   ;;  %v2131_v37 = vld [vmem:[%s2888_s3 + $0x20] sm:$0xff]   ;;  %v2133_v5 = vld [vmem:[%s2888_s3 + $0x30] sm:$0xff]  }
  0x5f   :  { %v1836_v31 = vcombine.low %v1245_v4, %v1248_v12  ;;  %v1255_v48 = vsel %vm2717_vm12, %v1253_v19, %v1254_v61  ;;  %v1265_v34 = vrot.slane %v2315_v11, 6  ;;  %v1259_v1 = vsel %vm2717_vm12, %v1826_v47, %v1258_v7  ;;  %v2132_v61 = vld [vmem:[%s2888_s3 + $0x28] sm:$0xff]   ;;  %v2134_v4 = vld [vmem:[%s2888_s3 + $0x38] sm:$0xff]  }
  0x60   :  { %1999 = vmatmul.mubr.msk.bf16.gmra.mrb[12].mxu0 %vm286_vm2, %v1813_v35  ;;  %v1262_v21 = vsel %vm2717_vm12, %v1260_v28, %v1261_v63  ;;  %v1272_v2 = vrot.slane %v2370_v62, 6  ;;  %v1837_v0 = vcombine.low %v1252_v50, %v1255_v48  ;;  %v1827_v13 = vrot.slane %v1218_v57, 10 }
  0x61   :  { %2006 = vmatprep.mubr.msk.bf16.mxu0 %vm286_vm2, %v1836_v31  ;;  %v1838_v11 = vcombine.low %v1259_v1, %v1262_v21  ;;  %v1267_v52 = vrot.slane %v1265_v34, 4  ;;  %v1268_v56 = vrot.slane %v2598_v53, 6  ;;  %v1828_v16 = vrot.slane %v1219_v22, 10 }
  0x62   :  { %v1274_v54 = vrot.slane %v1272_v2, 4  ;;  %v1275_v46 = vrot.slane %v2629_v30, 6  ;;  %v1266_v62 = vsel %vm2717_vm12, %v1827_v13, %v1265_v34  ;;  %v1279_v36 = vrot.slane %v2393_v18, 6  ;;  %v1220_v30 = vld [vmem:[%s2885_s0 + $0x3c] sm:$0xc] }
  0x63   :  { %v1269_v8 = vsel %vm2717_vm12, %v1267_v52, %v1268_v56  ;;  %v1273_v51 = vsel %vm2717_vm12, %v1828_v16, %v1272_v2  ;;  %v1286_v55 = vrot.slane %v2455_v10, 6  ;;  %v1829_v17 = vrot.slane %v1220_v30, 10  ;;  %v2846_v16 = vld [vmem:[%s2887_s2 + $0x8] sm:$0xff] }
  0x64   :  { %v1276_v53 = vsel %vm2717_vm12, %v1274_v54, %v1275_v46  ;;  %v1839_v32 = vcombine.low %v1266_v62, %v1269_v8  ;;  %v1281_v18 = vrot.slane %v1279_v36, 4  ;;  %v1282_v39 = vrot.slane %v2649_v14, 6 }
  0x65   :  { %v1840_v38 = vcombine.low %v1273_v51, %v1276_v53  ;;  %v1830_v15 = vrot.slane %v1221_v27, 10  ;;  %v1288_v26 = vrot.slane %v1286_v55, 4  ;;  %v1289_v60 = vrot.slane %v2672_v29, 6  ;;  %v1222_v29 = vld [vmem:[%s2885_s0 + $0x54] sm:$0xc] }
  0x66   :  { %v1280_v10 = vsel %vm2717_vm12, %v1829_v17, %v1279_v36  ;;  %v1283_v40 = vsel %vm2717_vm12, %v1281_v18, %v1282_v39  ;;  %v1293_v23 = vrot.slane %v2470_v49, 6  ;;  %v1831_v9 = vrot.slane %v1222_v29, 10 }
  0x67   :  { %v1287_v3 = vsel %vm2717_vm12, %v1830_v15, %v1286_v55  ;;  %v1290_v14 = vsel %vm2717_vm12, %v1288_v26, %v1289_v60  ;;  %v1841_v44 = vcombine.low %v1280_v10, %v1283_v40  ;;  %v1296_v33 = vrot.slane %v2689_v24, 6  ;;  %v2128_v24 = vld [vmem:[%s2888_s3 + $0x8] sm:$0xff]  }
  0x68   :  { %2007 = vmatmul.mubr.msk.bf16.vlgmr.msra.gmra.mrb[0].mxu0 %vm286_vm2, %v1837_v0  ;;  %v1842_v59 = vcombine.low %v1287_v3, %v1290_v14  ;;  %v1295_v45 = vrot.slane %v1293_v23, 4  ;;  %v1294_v49 = vsel %vm2717_vm12, %v1831_v9, %v1293_v23  ;;  %v2159_v25 = vmov 0.0   ;;  %v2841_v0 = vld [vmem:[%s2887_s2] sm:$0xff] }
  0x69   :  { %2010 = vmatprep.mubr.msk.bf16.mxu0 %vm286_vm2, %v1838_v11  ;;  %2022 = vmatprep.subr.bf16.mxu1 %v2159_v25  ;;  %vm2160_vm13 = vmmov 0   ;;  %vm1613_vm14 = vcmask 1041409   ;;  %vm1615_vm15 = vcmask 1042434   ;;  %vm1617_vm0 = vcmask 1043459  }
  0x6a   :  { %v1297_v58 = vsel %vm2717_vm12, %v1295_v45, %v1296_v33  ;;  %2023 = vmatpush3.bf16.msra.mxu1 %v2127_v20  ;;  %2038 = vmatprep.mubr.msk.bf16.mxu1 %vm2160_vm13, %v2159_v25  ;;  %vm1619_vm1 = vcmask 1044484   ;;  %vm1623_vm3 = vcmask 1046534   ;;  %vm1625_vm4 = vcmask 1047559  }
  0x6b   :  { %v1843_v6 = vcombine.low %v1294_v49, %v1297_v58  ;;  %2024 = vmatprep.subr.bf16.mxu1 %v2159_v25 }
  0x6e   :  { %2025 = vmatpush3.bf16.msra.mxu1 %v2128_v24 }
  0x6f   :  { %2026 = vmatprep.subr.bf16.mxu1 %v2159_v25 }
  0x70   :  { %2011 = vmatmul.mubr.msk.bf16.gmra.mrb[4].mxu0 %vm286_vm2, %v1839_v32 }
  0x71   :  { %2014 = vmatprep.mubr.msk.bf16.mxu0 %vm286_vm2, %v1840_v38 }
  0x72   :  { %2027 = vmatpush3.bf16.msra.mxu1 %v2129_v41 }
  0x73   :  { %2028 = vmatprep.subr.bf16.mxu1 %v2159_v25 }
  0x76   :  { %2029 = vmatpush3.bf16.msra.mxu1 %v2130_v43 }
  0x77   :  { %2030 = vmatprep.subr.bf16.mxu1 %v2159_v25 }
  0x78   :  { %2015 = vmatmul.mubr.msk.bf16.gmra.mrb[8].mxu0 %vm286_vm2, %v1841_v44 }
  0x79   :  { %2018 = vmatprep.mubr.msk.bf16.mxu0 %vm286_vm2, %v1842_v59 }
  0x7a   :  { %2031 = vmatpush3.bf16.msra.mxu1 %v2131_v37 }
  0x7b   :  { %2032 = vmatprep.subr.bf16.mxu1 %v2159_v25 }
  0x7e   :  { %2033 = vmatpush3.bf16.msra.mxu1 %v2132_v61 }
  0x7f   :  { %2034 = vmatprep.subr.bf16.mxu1 %v2159_v25 }
  0x80   :  { %2019 = vmatmul.mubr.msk.bf16.gmra.mrb[12].mxu0 %vm286_vm2, %v1843_v6  ;;  %vm1621_vm2 = vcmask 1045509  }
  0x82   :  { %2035 = vmatpush3.bf16.msra.mxu1 %v2133_v5 }
  0x83   :  { %2036 = vmatprep.subr.bf16.mxu1 %v2159_v25 }
  0x86   :  { %2037 = vmatpush3.bf16.msra.mxu1 %v2134_v4 }
 0x119   :  { %v1948_v42 = vpop.f32.mrb[0].mxu1 }
 0x11a   :  { %v518_v7 = vpop.f32.mrb[1].mxu1 }
 0x11b   :  { %v1949_v35 = vpop.f32.mrb[2].mxu1 }
 0x11c   :  { %v521_v19 = vpop.f32.mrb[3].mxu1 }
 0x121   :  { %v1952_v47 = vpop.f32.mrb[4].mxu1 }
 0x122   :  { %v534_v63 = vpop.f32.mrb[5].mxu1 }
 0x123   :  { %v1953_v12 = vpop.f32.mrb[6].mxu1 }
 0x124   :  { %v537_v28 = vpop.f32.mrb[7].mxu1 }
 0x129   :  { %v1956_v31 = vpop.f32.mrb[8].mxu1 }
 0x12a   :  { %v550_v50 = vpop.f32.mrb[9].mxu1 }
 0x12b   :  { %v1957_v48 = vpop.f32.mrb[10].mxu1 }
 0x12c   :  { %v2828_v34 = vpop.f32.mrb[11].mxu1 }
 0x131   :  { %v2830_v1 = vpop.f32.mrb[12].mxu1 }
 0x132   :  { %v2832_v21 = vpop.f32.mrb[13].mxu1 }
 0x133   :  { %v2834_v57 = vpop.f32.mrb[14].mxu1 }
 0x134   :  { %v2836_v2 = vpop.f32.mrb[15].mxu1 }
 0x13b   :  { %v2008_v22 = vpop.f32.mrb[0].mxu0 }
 0x13c   :  { %v2042_v11 = vadd.f32 %v2008_v22, %v1948_v42  ;;  %v1397_v13 = vpop.f32.mrb[1].mxu0 }
 0x13d   :  { %v2043_v52 = vadd.f32 %v1397_v13, %v518_v7  ;;  %v2009_v56 = vpop.f32.mrb[2].mxu0 }
 0x13e   :  { %v1480_v54 = vadd.f32 %v2042_v11, %v2841_v0  ;;  %v2044_v46 = vadd.f32 %v2009_v56, %v1949_v35  ;;  %v1400_v62 = vpop.f32.mrb[3].mxu0 }
 0x13f   :  { %v1478_v8 = vadd.f32 %v2043_v52, %v2841_v0  ;;  %v2045_v36 = vadd.f32 %v1400_v62, %v521_v19 }
 0x140   :  { %v1481_v51 = vadd.f32 %v2044_v46, %v2846_v16  ;;  %v1496_v30 = vmax.f32 %v1480_v54, 0.0 }
 0x141   :  { %v1479_v53 = vadd.f32 %v2045_v36, %v2846_v16  ;;  %v1494_v27 = vmax.f32 %v1478_v8, 0.0 }
 0x142   :  { %v1497_v55 = vmax.f32 %v1481_v51, 0.0 }
 0x143   :  { %v1495_v32 = vmax.f32 %v1479_v53, 0.0  ;;  %v2012_v38 = vpop.f32.mrb[4].mxu0 }
 0x144   :  { %v1517_v17 = vmax.f32 %v1496_v30, %v1497_v55  ;;  %v2046_v18 = vadd.f32 %v2012_v38, %v1952_v47  ;;  %v1413_v39 = vpop.f32.mrb[5].mxu0 }
 0x145   :  { %v1510_v15 = vmax.f32 %v1494_v27, %v1495_v32  ;;  %v2047_v26 = vadd.f32 %v1413_v39, %v534_v63  ;;  %v2013_v60 = vpop.f32.mrb[6].mxu0 }
 0x146   :  { %v1518_v10 = vrot.slane %v1517_v17, 4  ;;  %v1484_v40 = vadd.f32 %v2046_v18, %v2841_v0  ;;  %v2048_v23 = vadd.f32 %v2013_v60, %v1953_v12  ;;  %v1416_v3 = vpop.f32.mrb[7].mxu0 }
 0x147   :  { %v1511_v14 = vrot.slane %v1510_v15, 4  ;;  %v1482_v29 = vadd.f32 %v2047_v26, %v2841_v0  ;;  %v2049_v44 = vadd.f32 %v1416_v3, %v537_v28 }
 0x148   :  { %v1519_v59 = vmax.f32 %v1517_v17, %v1518_v10  ;;  %v1485_v9 = vadd.f32 %v2048_v23, %v2846_v16  ;;  %v1500_v58 = vmax.f32 %v1484_v40, 0.0 }
 0x149   :  { %v1512_v45 = vmax.f32 %v1510_v15, %v1511_v14  ;;  %v1483_v33 = vadd.f32 %v2049_v44, %v2846_v16  ;;  %v1498_v25 = vmax.f32 %v1482_v29, 0.0 }
 0x14a   :  { %v1520_v49 = vrot.slane %v1519_v59, 2  ;;  %v1501_v6 = vmax.f32 %v1485_v9, 0.0 }
 0x14b   :  { %v1513_v20 = vrot.slane %v1512_v45, 2  ;;  %v1499_v24 = vmax.f32 %v1483_v33, 0.0  ;;  %v2016_v41 = vpop.f32.mrb[8].mxu0 }
 0x14c   :  { %v1521_v43 = vmax.f32 %v1519_v59, %v1520_v49  ;;  %v1531_v37 = vmax.f32 %v1500_v58, %v1501_v6  ;;  %v2050_v61 = vadd.f32 %v2016_v41, %v1956_v31  ;;  %v1429_v5 = vpop.f32.mrb[9].mxu0 }
 0x14d   :  { %v1514_v4 = vmax.f32 %v1512_v45, %v1513_v20  ;;  %v1524_v42 = vmax.f32 %v1498_v25, %v1499_v24  ;;  %v2051_v7 = vadd.f32 %v1429_v5, %v550_v50  ;;  %v2017_v35 = vpop.f32.mrb[10].mxu0 }
 0x14e   :  { %v1522_v19 = vrot.slane %v1521_v43, 1  ;;  %v1532_v47 = vrot.slane %v1531_v37, 4  ;;  %v1488_v63 = vadd.f32 %v2050_v61, %v2841_v0  ;;  %v2052_v12 = vadd.f32 %v2017_v35, %v1957_v48  ;;  %v1432_v28 = vpop.f32.mrb[11].mxu0 }
 0x14f   :  { %v1515_v22 = vrot.slane %v1514_v4, 1  ;;  %v1525_v11 = vrot.slane %v1524_v42, 4  ;;  %v1486_v13 = vadd.f32 %v2051_v7, %v2841_v0  ;;  %v2053_v52 = vadd.f32 %v1432_v28, %v2828_v34 }
 0x150   :  { %v1523_v56 = vmax.f32 %v1521_v43, %v1522_v19  ;;  %v1533_v54 = vmax.f32 %v1531_v37, %v1532_v47  ;;  %v1489_v31 = vadd.f32 %v2052_v12, %v2846_v16  ;;  %v1504_v51 = vmax.f32 %v1488_v63, 0.0 }
 0x151   :  { %v1516_v46 = vmax.f32 %v1514_v4, %v1515_v22  ;;  %v1526_v50 = vmax.f32 %v1524_v42, %v1525_v11  ;;  %v1487_v62 = vadd.f32 %v2053_v52, %v2846_v16  ;;  %v1502_v55 = vmax.f32 %v1486_v13, 0.0 }
 0x152   :  { %v1567_v8 = vpack.c.bf16 %v1523_v56, %v1523_v56  ;;  %v1534_v36 = vrot.slane %v1533_v54, 2  ;;  %v1505_v48 = vmax.f32 %v1489_v31, 0.0 }
 0x153   :  { %v1566_v53 = vpack.c.bf16 %v1516_v46, %v1516_v46  ;;  %v1527_v30 = vrot.slane %v1526_v50, 2  ;;  %v1503_v27 = vmax.f32 %v1487_v62, 0.0  ;;  %v2020_v32 = vpop.f32.mrb[12].mxu0 }
 0x154   :  { %v1606_v38 = vunpack.c.l.b16 %v1567_v8  ;;  %v1535_v34 = vmax.f32 %v1533_v54, %v1534_v36  ;;  %v1545_v17 = vmax.f32 %v1504_v51, %v1505_v48  ;;  %v2054_v18 = vadd.f32 %v2020_v32, %v2830_v1  ;;  %v1445_v39 = vpop.f32.mrb[13].mxu0 }
 0x155   :  { %v1605_v15 = vunpack.c.l.b16 %v1566_v53  ;;  %v1528_v26 = vmax.f32 %v1526_v50, %v1527_v30  ;;  %v1538_v60 = vmax.f32 %v1502_v55, %v1503_v27  ;;  %v2055_v10 = vadd.f32 %v1445_v39, %v2832_v21  ;;  %v2021_v40 = vpop.f32.mrb[14].mxu0 }
 0x156   :  { %v1536_v23 = vrot.slane %v1535_v34, 1  ;;  %v1546_v3 = vrot.slane %v1545_v17, 4  ;;  %v1492_v14 = vadd.f32 %v2054_v18, %v2841_v0  ;;  %v2056_v29 = vadd.f32 %v2021_v40, %v2834_v57  ;;  %v1448_v44 = vpop.f32.mrb[15].mxu0 }
 0x157   :  { %v1614_v59 = vsel %vm1613_vm14, %v1606_v38, %v1605_v15  ;;  %v1529_v9 = vrot.slane %v1528_v26, 1  ;;  %v1539_v45 = vrot.slane %v1538_v60, 4  ;;  %v1490_v21 = vadd.f32 %v2055_v10, %v2841_v0 }
 0x158   :  { %v1537_v33 = vmax.f32 %v1535_v34, %v1536_v23  ;;  %v1547_v1 = vmax.f32 %v1545_v17, %v1546_v3  ;;  %v1493_v49 = vadd.f32 %v2056_v29, %v2846_v16  ;;  %v2057_v20 = vadd.f32 %v1448_v44, %v2836_v2 }
 0x159   :  { %v1530_v58 = vmax.f32 %v1528_v26, %v1529_v9  ;;  %v1540_v6 = vmax.f32 %v1538_v60, %v1539_v45  ;;  %v1508_v41 = vmax.f32 %v1492_v14, 0.0  ;;  %v1506_v35 = vmax.f32 %v1490_v21, 0.0  ;;  %v1854_v60 = vld [vmem:[%s2889_s4] ss:$0 sm:$0xff] }
 0x15a   :  { %v1569_v25 = vpack.c.bf16 %v1537_v33, %v1537_v33  ;;  %v1548_v24 = vrot.slane %v1547_v1, 2  ;;  %v1509_v43 = vmax.f32 %v1493_v49, 0.0  ;;  %v1491_v61 = vadd.f32 %v2057_v20, %v2846_v16 }
 0x15b   :  { %v1568_v57 = vpack.c.bf16 %v1530_v58, %v1530_v58  ;;  %v1541_v37 = vrot.slane %v1540_v6, 2 }
 0x15c   :  { %v1549_v5 = vmax.f32 %v1547_v1, %v1548_v24  ;;  %v1559_v4 = vmax.f32 %v1508_v41, %v1509_v43  ;;  %v1507_v19 = vmax.f32 %v1491_v61, 0.0  ;;  %v1608_v47 = vunpack.c.l.b16 %v1569_v25 }
 0x15d   :  { %v1607_v42 = vunpack.c.l.b16 %v1568_v57  ;;  %v1542_v7 = vmax.f32 %v1540_v6, %v1541_v37 }
 0x15e   :  { %v1550_v0 = vrot.slane %v1549_v5, 1  ;;  %v1560_v63 = vrot.slane %v1559_v4, 4  ;;  %v1552_v28 = vmax.f32 %v1506_v35, %v1507_v19 }
 0x15f   :  { %v1616_v2 = vsel %vm1615_vm15, %v1607_v42, %v1614_v59  ;;  %v1543_v12 = vrot.slane %v1542_v7, 1 }
 0x160   :  { %v1551_v22 = vmax.f32 %v1549_v5, %v1550_v0  ;;  %v1618_v11 = vsel %vm1617_vm0, %v1608_v47, %v1616_v2  ;;  %v1561_v13 = vmax.f32 %v1559_v4, %v1560_v63  ;;  %v1553_v56 = vrot.slane %v1552_v28, 4 }
 0x161   :  { %v1544_v52 = vmax.f32 %v1542_v7, %v1543_v12 }
 0x162   :  { %v1571_v16 = vpack.c.bf16 %v1551_v22, %v1551_v22  ;;  %v1562_v54 = vrot.slane %v1561_v13, 2  ;;  %v1554_v46 = vmax.f32 %v1552_v28, %v1553_v56 }
 0x163   :  { %v1570_v31 = vpack.c.bf16 %v1544_v52, %v1544_v52 }
 0x164   :  { %v1563_v50 = vmax.f32 %v1561_v13, %v1562_v54  ;;  %v1555_v8 = vrot.slane %v1554_v46, 2  ;;  %v1610_v36 = vunpack.c.l.b16 %v1571_v16 }
 0x165   :  { %v1609_v62 = vunpack.c.l.b16 %v1570_v31 }
 0x166   :  { %v1564_v51 = vrot.slane %v1563_v50, 1  ;;  %v1556_v53 = vmax.f32 %v1554_v46, %v1555_v8 }
 0x167   :  { %v1620_v48 = vsel %vm1619_vm1, %v1609_v62, %v1618_v11 }
 0x168   :  { %v1565_v30 = vmax.f32 %v1563_v50, %v1564_v51  ;;  %v1622_v55 = vsel %vm1621_vm2, %v1610_v36, %v1620_v48  ;;  %v1557_v27 = vrot.slane %v1556_v53, 1 }
 0x16a   :  { %v1558_v32 = vmax.f32 %v1556_v53, %v1557_v27  ;;  %v1573_v38 = vpack.c.bf16 %v1565_v30, %v1565_v30 }
 0x16c   :  { %v1572_v34 = vpack.c.bf16 %v1558_v32, %v1558_v32  ;;  %v1612_v18 = vunpack.c.l.b16 %v1573_v38 }
 0x16e   :  { %v1611_v17 = vunpack.c.l.b16 %v1572_v34 }
 0x170   :  { %v1624_v39 = vsel %vm1623_vm3, %v1611_v17, %v1622_v55 }
 0x171   :  { %v1626_v15 = vsel %vm1625_vm4, %v1612_v18, %v1624_v39 }
 0x172   :  { %v1627_v26 = vpack.c.b16 %v1626_v15, %v1626_v15 }
 0x174   :  { %2039 = vmatmul.mubr.bf16.vlgmr.msra.gmra.mrb[16].mxu1 %v1627_v26 }
 0x247   :  { %v1711_v10 = vpop.f32.mrb[16].mxu1 }
 0x248   :  { %v1712_v40 = vadd.f32 %v1854_v60, %v1711_v10  ;;  %v2040_v23 = vpop.f32.mrb[17].mxu1 }
 0x249   :  { %v1714_v3 = vpop.f32.mrb[18].mxu1 }
 0x24a   :  { %1717 = vst [vmem:[#allocation2] sm:$0xff] %v1712_v40  ;;  %v2041_v14 = vpop.f32.mrb[19].mxu1 }
 0x24b   :  { %2146 = shalt.err (!%p2143_p4)
}
 0x24c   :  { %s2147_s4 = scalar_lea.hbm %s2890_s5, 128 }
 0x24d   :  { %p2148_p5 = scmp.ne.s32.totalorder %s2890_s5, %s2147_s4  ;;  %p2151_p6 = scmp.lt.u32.totalorder %s2147_s4, %s2890_s5 }
 0x24f   :  { %p2153_p7 = pnand %p2151_p6, %p2148_p5 }
 0x251   :  { %2156 = shalt.err (!%p2153_p7)
}
 0x252   :  { %1727 = dma.vmem_to_hbm [thread:$0]  %s1725_s27, 128, %s2890_s5, [#allocation3]  }
 0x253   :  { %2157 = dma.done.wait [#allocation3], 128  }
 0x254   :  { %2158 = vsyncadd [#allocation3], 4294967168 }
 0x255   :  { %1731 = vsyncpa [#allocation3], 1 }

</bundles_post_ra>
